<compile_context>
chip_gen: v7x
topology: tpu7x:2x2x1
jax: 0.10.0
libtpu: 0.0.40
codegen_flags: <defaults>
</compile_context>

<pallas_src>
import functools

import jax
import jax.numpy as jnp
from jax.experimental import pallas as pl
from jax.experimental.pallas import tpu as pltpu


def _round_up(x, m):
    return (x + m - 1) // m * m


# ----------------------------------------------------------------------------
# Pallas kernel 1: tiled fused linear (bf16 matmul + bias + optional ReLU).
# Used for: patchify-conv backbone stages and the fused 1x1-conv FCOS head.
# ----------------------------------------------------------------------------
def _linear_kernel(x_ref, w_ref, b_ref, o_ref, *, act, relu_lo, relu_hi):
    y = jnp.dot(x_ref[...], w_ref[...], preferred_element_type=jnp.float32)
    y = y + b_ref[...]                       # (1, N) f32 bias broadcast
    if act == "relu":
        y = jnp.maximum(y, 0.0)
    elif act == "relu_cols":
        # Static column mask: ReLU only the reg columns of the fused head.
        col = jax.lax.broadcasted_iota(jnp.int32, y.shape, 1)
        mask = (col >= relu_lo) & (col < relu_hi)
        y = jnp.where(mask, jnp.maximum(y, 0.0), y)
    o_ref[...] = y.astype(o_ref.dtype)


def pallas_linear(x, w, b, *, act="none", relu_cols=(0, 0),
                  out_dtype=jnp.float32, block_m=512):
    """y = act(x @ w + b), tiled over M, bf16 MXU inputs, f32 accumulate."""
    M, K = x.shape
    N = w.shape[1]

    x = x.astype(jnp.bfloat16)
    w = w.astype(jnp.bfloat16)
    b = b.reshape(1, N).astype(jnp.float32)

    # Tile M; pad to a multiple of the tile (8-aligned for the sublane dim).
    tm = min(block_m, _round_up(M, 8))
    Mp = _round_up(M, tm)
    if Mp != M:
        x = jnp.pad(x, ((0, Mp - M), (0, 0)))

    out_bytes = Mp * N * jnp.dtype(out_dtype).itemsize
    cost = pl.CostEstimate(
        flops=2 * Mp * K * N,
        transcendentals=0,
        bytes_accessed=Mp * K * 2 + K * N * 2 + N * 4 + out_bytes,
    )

    kernel = functools.partial(_linear_kernel, act=act,
                               relu_lo=relu_cols[0], relu_hi=relu_cols[1])
    out = pl.pallas_call(
        kernel,
        grid=(Mp // tm,),
        in_specs=[
            pl.BlockSpec((tm, K), lambda i: (i, 0)),
            pl.BlockSpec((K, N), lambda i: (0, 0)),
            pl.BlockSpec((1, N), lambda i: (0, 0)),
        ],
        out_specs=pl.BlockSpec((tm, N), lambda i: (i, 0)),
        out_shape=jax.ShapeDtypeStruct((Mp, N), out_dtype),
        compiler_params=pltpu.CompilerParams(
            dimension_semantics=("parallel",),
            # Tiles are sized against v7x's 64 MiB physical VMEM; 48 MiB keeps
            # headroom for internal scratch (also valid on v5e/v6e: 128 MiB).
            vmem_limit_bytes=48 * 1024 * 1024,
        ),
        cost_estimate=cost,
    )(x, w, b)
    return out[:M] if Mp != M else out


# ----------------------------------------------------------------------------
# Pallas kernel 2: per-position detection score.
#   score = sqrt(sigmoid(max_c cls_logit) * sigmoid(cnt_logit))
# Input is the fused head tensor (B, P, 128); output is lane-dense (B, 1, P).
# ----------------------------------------------------------------------------
def _score_kernel(head_ref, scores_ref, *, num_classes, cnt_col, add_centerness):
    x = head_ref[0].astype(jnp.float32)                       # (tp, Npad)
    col = jax.lax.broadcasted_iota(jnp.int32, x.shape, 1)
    # Class max over the real class columns only (pad columns masked to -inf).
    cls_max = jnp.max(jnp.where(col < num_classes, x, jnp.float32(-1e30)),
                      axis=-1)                                # (tp,)
    score = jax.nn.sigmoid(cls_max)
    if add_centerness:
        cnt = jnp.sum(jnp.where(col == cnt_col, x, 0.0), axis=-1)   # (tp,)
        score = jnp.sqrt(score * jax.nn.sigmoid(cnt))
    scores_ref[0, 0, :] = score


def pallas_scores(head, *, tp, num_classes, add_centerness):
    B, P_pad, Npad = head.shape
    kernel = functools.partial(_score_kernel, num_classes=num_classes,
                               cnt_col=num_classes + 4,
                               add_centerness=add_centerness)
    out = pl.pallas_call(
        kernel,
        grid=(B, P_pad // tp),
        in_specs=[pl.BlockSpec((1, tp, Npad), lambda b, p: (b, p, 0))],
        out_specs=pl.BlockSpec((1, 1, tp), lambda b, p: (b, 0, p)),
        out_shape=jax.ShapeDtypeStruct((B, 1, P_pad), jnp.float32),
        compiler_params=pltpu.CompilerParams(
            dimension_semantics=("parallel", "parallel")),
    )(head)
    return out[:, 0, :]                                       # (B, P_pad)


# ----------------------------------------------------------------------------
# Glue: synthetic Encoder (patchify backbone + shared fused 1x1-conv FCOS head)
# ----------------------------------------------------------------------------
def conv_patchify(x_nhwc, w, b, k, act):
    """Conv with kernel_size = stride = k (patch embedding) as a Pallas matmul."""
    B, H, W, C = x_nhwc.shape
    h, w_ = H // k, W // k
    # TODO(synk): fold this k x k patch gather into the matmul kernel's BlockSpec
    # index_map (read (tm, k, k, C) NHWC windows directly) to avoid the extra
    # HBM round trip of the reshape/transpose — matters most on v5e.
    x = x_nhwc.reshape(B, h, k, w_, k, C).transpose(0, 1, 3, 2, 4, 5)
    x = x.reshape(B * h * w_, k * k * C)
    y = pallas_linear(x, w, b, act=act, out_dtype=jnp.bfloat16)
    return y.reshape(B, h, w_, -1)


def encoder_forward(params, x_nhwc, *, num_classes):
    # backbone / neck: two patchify stages -> features at strides 8 and 16
    f1 = conv_patchify(x_nhwc, params["w1"], params["b1"], k=8, act="relu")
    f2 = conv_patchify(f1, params["w2"], params["b2"], k=2, act="relu")
    feats = [f1, f2]
    level_shapes = [(f.shape[1], f.shape[2]) for f in feats]
    B = x_nhwc.shape[0]
    hidden = f1.shape[-1]

    # Shared 1x1-conv head across all levels fused into ONE lane-dense matmul.
    flat = jnp.concatenate([f.reshape(B, -1, hidden) for f in feats], axis=1)
    P = flat.shape[1]
    nc = num_classes
    head = pallas_linear(flat.reshape(B * P, hidden),
                         params["w_head"], params["b_head"],
                         act="relu_cols", relu_cols=(nc, nc + 4),
                         out_dtype=jnp.float32)
    head = head.reshape(B, P, -1)                              # (B, P, 128)

    # Per-level (cls, reg, cnt) views — the Encoder.forward contract.
    cls_list, reg_list, cnt_list = [], [], []
    off = 0
    for (h, w) in level_shapes:
        n = h * w
        blk = head[:, off:off + n]
        cls_list.append(blk[..., :nc].reshape(B, h, w, nc))
        reg_list.append(blk[..., nc:nc + 4].reshape(B, h, w, 4))
        cnt_list.append(blk[..., nc + 4:nc + 5].reshape(B, h, w, 1))
        off += n
    return (cls_list, reg_list, cnt_list), head, level_shapes


def coords_fmap2orig(h, w, stride):
    shifts_x = jnp.arange(0, w * stride, stride, dtype=jnp.float32)
    shifts_y = jnp.arange(0, h * stride, stride, dtype=jnp.float32)
    shift_y, shift_x = jnp.meshgrid(shifts_y, shifts_x, indexing="ij")
    coords = jnp.stack([shift_x.reshape(-1), shift_y.reshape(-1)], axis=-1)
    return coords + float(stride // 2)


# ----------------------------------------------------------------------------
# Full FCOS inference forward
# ----------------------------------------------------------------------------
def fcos_forward(params, batch_images_nchw, *, strides, max_detection,
                 num_classes, add_centerness=True):
    img_h, img_w = batch_images_nchw.shape[2], batch_images_nchw.shape[3]
    x_nhwc = jnp.transpose(batch_images_nchw, (0, 2, 3, 1)).astype(jnp.bfloat16)

    (cls_list, reg_list, cnt_list), head, level_shapes = encoder_forward(
        params, x_nhwc, num_classes=num_classes)
    del cls_list, reg_list, cnt_list  # Encoder outputs; decode uses the fused head.

    coords = jnp.concatenate(
        [coords_fmap2orig(h, w, s) for (h, w), s in zip(level_shapes, strides)],
        axis=0)                                                # (P, 2)

    B, P, _ = head.shape
    nc = num_classes

    # Pad P so the score kernel stores stay lane-dense (tiles of 128..512).
    tp = min(512, _round_up(P, 128))
    P_pad = _round_up(P, tp)
    if P_pad != P:
        head_p = jnp.pad(head, ((0, 0), (0, P_pad - P), (0, 0)))
        coords_p = jnp.pad(coords, ((0, P_pad - P), (0, 0)))
    else:
        head_p, coords_p = head, coords

    scores_all = pallas_scores(head_p, tp=tp, num_classes=nc,
                               add_centerness=add_centerness)[:, :P]   # (B, P)

    max_num = min(max_detection, P)
    topk_scores, topk_ind = jax.lax.top_k(scores_all, max_num)

    # Classes / boxes only for the top-k rows (O(max_detection), plain XLA).
    cls_logits = jnp.take_along_axis(head_p[..., :nc],
                                     topk_ind[..., None], axis=1)      # (B,k,nc)
    classes_topk = jnp.argmax(cls_logits, axis=-1).astype(jnp.int32) + 1

    reg_topk = jnp.take_along_axis(head_p[..., nc:nc + 4],
                                   topk_ind[..., None], axis=1)        # (B,k,4)
    coords4 = jnp.concatenate([coords_p, coords_p], axis=-1)           # (P,4) [x,y,x,y]
    coords4_topk = coords4[topk_ind]                                   # (B,k,4)
    sign = jnp.array([-1.0, -1.0, 1.0, 1.0], jnp.float32)
    boxes = coords4_topk + reg_topk * sign
    boxes = jnp.maximum(boxes, 0.0)
    boxes = jnp.minimum(boxes, jnp.array(
        [img_w - 1, img_h - 1, img_w - 1, img_h - 1], jnp.float32))

    # TODO(synk): score-threshold masking + per-class NMS (Decoder._post_process /
    # box_nms) produce data-dependent variable-length outputs and are not
    # expressible with static shapes; returning clipped top-k detections instead.
    return topk_scores, classes_topk, boxes


# ----------------------------------------------------------------------------
# Deterministic parameter construction (fused head weights, lane-padded N=128)
# ----------------------------------------------------------------------------
def make_params(key, in_ch=3, hidden=32, num_classes=8, n_head=128):
    ks = jax.random.split(key, 8)

    def init(k, shape, fan_in):
        return jax.random.normal(k, shape, jnp.float32) / jnp.sqrt(fan_in)

    nc = num_classes
    w_cls = init(ks[2], (hidden, nc), hidden)
    w_reg = init(ks[3], (hidden, 4), hidden)
    w_cnt = init(ks[4], (hidden, 1), hidden)
    w_head = jnp.zeros((hidden, n_head), jnp.float32)
    w_head = (w_head.at[:, :nc].set(w_cls)
                     .at[:, nc:nc + 4].set(w_reg)
                     .at[:, nc + 4:nc + 5].set(w_cnt))
    b_head = jnp.zeros((n_head,), jnp.float32)
    b_head = b_head.at[:nc].set(-2.0).at[nc:nc + 4].set(1.0)

    return {
        "w1": init(ks[0], (8 * 8 * in_ch, hidden), 8 * 8 * in_ch),
        "b1": jnp.zeros((hidden,), jnp.float32),
        "w2": init(ks[1], (2 * 2 * hidden, hidden), 2 * 2 * hidden),
        "b2": jnp.zeros((hidden,), jnp.float32),
        "w_head": w_head,
        "b_head": b_head,
    }


if __name__ == "__main__":
    key = jax.random.PRNGKey(0)
    k_img, k_par = jax.random.split(key)

    # small deterministic example input, NCHW like PyTorch
    batch_images = jax.random.normal(k_img, (2, 3, 32, 32), jnp.float32)
    num_classes = 8
    params = make_params(k_par, in_ch=3, hidden=32, num_classes=num_classes)

    strides = [8, 16]            # feature strides of the two synthetic FPN levels
    max_detection = 16

    fwd = jax.jit(functools.partial(
        fcos_forward, strides=strides, max_detection=max_detection,
        num_classes=num_classes, add_centerness=True))

    cls_scores, cls_idxs, boxes = fwd(params, batch_images)
    jax.block_until_ready((cls_scores, cls_idxs, boxes))

    assert cls_scores.shape == (2, 16)
    assert cls_idxs.shape == (2, 16)
    assert boxes.shape == (2, 16, 4)
    print("KERNEL_OK")
</pallas_src>

<mosaic_0001>
module attributes {stable_mosaic.version = 11 : i64} {
  func.func @_linear_kernel(%arg0: i32, %arg1: memref<32x192xbf16, #tpu.memory_space<vmem>>, %arg2: memref<192x32xbf16, #tpu.memory_space<vmem>>, %arg3: memref<1x32xf32, #tpu.memory_space<vmem>>, %arg4: memref<32x32xbf16, #tpu.memory_space<vmem>>) attributes {dimension_semantics = [#tpu.dimension_semantics<parallel>], iteration_bounds = array<i64: 1>, scalar_prefetch = 0 : i64, scratch_operands = 0 : i64, tpu.core_type = #tpu.core_type<tc>, window_params = [{transform_indices = @transform_0, window_bounds = array<i64: 32, 192>}, {pipeline_mode = #tpu.pipeline_mode<synchronous>, transform_indices = @transform_1, window_bounds = array<i64: 192, 32>}, {pipeline_mode = #tpu.pipeline_mode<synchronous>, transform_indices = @transform_2, window_bounds = array<i64: 1, 32>}, {transform_indices = @transform_3, window_bounds = array<i64: 32, 32>}]} {
    %c0 = arith.constant 0 : index
    %c0_0 = arith.constant 0 : index
    %0 = vector.load %arg1[%c0, %c0_0] : memref<32x192xbf16, #tpu.memory_space<vmem>>, vector<32x192xbf16>
    %c0_1 = arith.constant 0 : index
    %c0_2 = arith.constant 0 : index
    %1 = vector.load %arg2[%c0_1, %c0_2] : memref<192x32xbf16, #tpu.memory_space<vmem>>, vector<192x32xbf16>
    %cst = arith.constant dense<0.000000e+00> : vector<32x32xf32>
    %2 = tpu.matmul %0, %1, %cst {dimension_numbers = #tpu.dot_dimension_numbers<[1], [0], [0], [1], [0, 0, 1, 1], [], []>} : vector<32x192xbf16>, vector<192x32xbf16>, vector<32x32xf32> -> vector<32x32xf32>
    %c0_3 = arith.constant 0 : index
    %c0_4 = arith.constant 0 : index
    %3 = vector.load %arg3[%c0_3, %c0_4] : memref<1x32xf32, #tpu.memory_space<vmem>>, vector<1x32xf32>
    %4 = vector.broadcast %3 : vector<1x32xf32> to vector<32x32xf32>
    %5 = arith.addf %2, %4 : vector<32x32xf32>
    %cst_5 = arith.constant 0.000000e+00 : f32
    %6 = vector.broadcast %cst_5 : f32 to vector<32x32xf32>
    %7 = arith.maximumf %5, %6 : vector<32x32xf32>
    %8 = arith.truncf %7 : vector<32x32xf32> to vector<32x32xbf16>
    %c0_6 = arith.constant 0 : index
    %c0_7 = arith.constant 0 : index
    %9 = vector.load %arg4[%c0_6, %c0_7] : memref<32x32xbf16, #tpu.memory_space<vmem>>, vector<32x32xbf16>
    tpu.vector_store %arg4[%c0_6, %c0_7], %8 {strides = array<i32>} : memref<32x32xbf16, #tpu.memory_space<vmem>>, vector<32x32xbf16>,
    return
  }
  func.func @transform_0(%arg0: i32) -> (i32, i32) {
    %c0_i32 = arith.constant 0 : i32
    %c0_i32_0 = arith.constant 0 : i32
    return %arg0, %c0_i32 : i32, i32
  }
  func.func @transform_1(%arg0: i32) -> (i32, i32) {
    %c0_i32 = arith.constant 0 : i32
    %c0_i32_0 = arith.constant 0 : i32
    %c0_i32_1 = arith.constant 0 : i32
    return %c0_i32, %c0_i32_0 : i32, i32
  }
  func.func @transform_2(%arg0: i32) -> (i32, i32) {
    %c0_i32 = arith.constant 0 : i32
    %c0_i32_0 = arith.constant 0 : i32
    %c0_i32_1 = arith.constant 0 : i32
    return %c0_i32, %c0_i32_0 : i32, i32
  }
  func.func @transform_3(%arg0: i32) -> (i32, i32) {
    %c0_i32 = arith.constant 0 : i32
    %c0_i32_0 = arith.constant 0 : i32
    return %arg0, %c0_i32 : i32, i32
  }
}

module attributes {stable_mosaic.version = 11 : i64} {
  func.func @_linear_kernel(%arg0: i32, %arg1: memref<8x128xbf16, #tpu.memory_space<vmem>>, %arg2: memref<128x32xbf16, #tpu.memory_space<vmem>>, %arg3: memref<1x32xf32, #tpu.memory_space<vmem>>, %arg4: memref<8x32xbf16, #tpu.memory_space<vmem>>) attributes {dimension_semantics = [#tpu.dimension_semantics<parallel>], iteration_bounds = array<i64: 1>, scalar_prefetch = 0 : i64, scratch_operands = 0 : i64, tpu.core_type = #tpu.core_type<tc>, window_params = [{transform_indices = @transform_0, window_bounds = array<i64: 8, 128>}, {pipeline_mode = #tpu.pipeline_mode<synchronous>, transform_indices = @transform_1, window_bounds = array<i64: 128, 32>}, {pipeline_mode = #tpu.pipeline_mode<synchronous>, transform_indices = @transform_2, window_bounds = array<i64: 1, 32>}, {transform_indices = @transform_3, window_bounds = array<i64: 8, 32>}]} {
    %c0 = arith.constant 0 : index
    %c0_0 = arith.constant 0 : index
    %0 = vector.load %arg1[%c0, %c0_0] : memref<8x128xbf16, #tpu.memory_space<vmem>>, vector<8x128xbf16>
    %c0_1 = arith.constant 0 : index
    %c0_2 = arith.constant 0 : index
    %1 = vector.load %arg2[%c0_1, %c0_2] : memref<128x32xbf16, #tpu.memory_space<vmem>>, vector<128x32xbf16>
    %cst = arith.constant dense<0.000000e+00> : vector<8x32xf32>
    %2 = tpu.matmul %0, %1, %cst {dimension_numbers = #tpu.dot_dimension_numbers<[1], [0], [0], [1], [0, 0, 1, 1], [], []>} : vector<8x128xbf16>, vector<128x32xbf16>, vector<8x32xf32> -> vector<8x32xf32>
    %c0_3 = arith.constant 0 : index
    %c0_4 = arith.constant 0 : index
    %3 = vector.load %arg3[%c0_3, %c0_4] : memref<1x32xf32, #tpu.memory_space<vmem>>, vector<1x32xf32>
    %4 = vector.broadcast %3 : vector<1x32xf32> to vector<8x32xf32>
    %5 = arith.addf %2, %4 : vector<8x32xf32>
    %cst_5 = arith.constant 0.000000e+00 : f32
    %6 = vector.broadcast %cst_5 : f32 to vector<8x32xf32>
    %7 = arith.maximumf %5, %6 : vector<8x32xf32>
    %8 = arith.truncf %7 : vector<8x32xf32> to vector<8x32xbf16>
    %c0_6 = arith.constant 0 : index
    %c0_7 = arith.constant 0 : index
    %9 = vector.load %arg4[%c0_6, %c0_7] : memref<8x32xbf16, #tpu.memory_space<vmem>>, vector<8x32xbf16>
    tpu.vector_store %arg4[%c0_6, %c0_7], %8 {strides = array<i32>} : memref<8x32xbf16, #tpu.memory_space<vmem>>, vector<8x32xbf16>,
    return
  }
  func.func @transform_0(%arg0: i32) -> (i32, i32) {
    %c0_i32 = arith.constant 0 : i32
    %c0_i32_0 = arith.constant 0 : i32
    return %arg0, %c0_i32 : i32, i32
  }
  func.func @transform_1(%arg0: i32) -> (i32, i32) {
    %c0_i32 = arith.constant 0 : i32
    %c0_i32_0 = arith.constant 0 : i32
    %c0_i32_1 = arith.constant 0 : i32
    return %c0_i32, %c0_i32_0 : i32, i32
  }
  func.func @transform_2(%arg0: i32) -> (i32, i32) {
    %c0_i32 = arith.constant 0 : i32
    %c0_i32_0 = arith.constant 0 : i32
    %c0_i32_1 = arith.constant 0 : i32
    return %c0_i32, %c0_i32_0 : i32, i32
  }
  func.func @transform_3(%arg0: i32) -> (i32, i32) {
    %c0_i32 = arith.constant 0 : i32
    %c0_i32_0 = arith.constant 0 : i32
    return %arg0, %c0_i32 : i32, i32
  }
}

module attributes {stable_mosaic.version = 11 : i64} {
  func.func @_linear_kernel(%arg0: i32, %arg1: memref<40x32xbf16, #tpu.memory_space<vmem>>, %arg2: memref<32x128xbf16, #tpu.memory_space<vmem>>, %arg3: memref<1x128xf32, #tpu.memory_space<vmem>>, %arg4: memref<40x128xf32, #tpu.memory_space<vmem>>) attributes {dimension_semantics = [#tpu.dimension_semantics<parallel>], iteration_bounds = array<i64: 1>, scalar_prefetch = 0 : i64, scratch_operands = 0 : i64, tpu.core_type = #tpu.core_type<tc>, window_params = [{transform_indices = @transform_0, window_bounds = array<i64: 40, 32>}, {pipeline_mode = #tpu.pipeline_mode<synchronous>, transform_indices = @transform_1, window_bounds = array<i64: 32, 128>}, {pipeline_mode = #tpu.pipeline_mode<synchronous>, transform_indices = @transform_2, window_bounds = array<i64: 1, 128>}, {transform_indices = @transform_3, window_bounds = array<i64: 40, 128>}]} {
    %c0 = arith.constant 0 : index
    %c0_0 = arith.constant 0 : index
    %0 = vector.load %arg1[%c0, %c0_0] : memref<40x32xbf16, #tpu.memory_space<vmem>>, vector<40x32xbf16>
    %c0_1 = arith.constant 0 : index
    %c0_2 = arith.constant 0 : index
    %1 = vector.load %arg2[%c0_1, %c0_2] : memref<32x128xbf16, #tpu.memory_space<vmem>>, vector<32x128xbf16>
    %cst = arith.constant dense<0.000000e+00> : vector<40x128xf32>
    %2 = tpu.matmul %0, %1, %cst {dimension_numbers = #tpu.dot_dimension_numbers<[1], [0], [0], [1], [0, 0, 1, 1], [], []>} : vector<40x32xbf16>, vector<32x128xbf16>, vector<40x128xf32> -> vector<40x128xf32>
    %c0_3 = arith.constant 0 : index
    %c0_4 = arith.constant 0 : index
    %3 = vector.load %arg3[%c0_3, %c0_4] : memref<1x128xf32, #tpu.memory_space<vmem>>, vector<1x128xf32>
    %4 = vector.broadcast %3 : vector<1x128xf32> to vector<40x128xf32>
    %5 = arith.addf %2, %4 : vector<40x128xf32>
    %6 = tpu.iota {dimensions = array<i32: 1>} : vector<40x128xi32>
    %c8_i32 = arith.constant 8 : i32
    %7 = vector.broadcast %c8_i32 : i32 to vector<40x128xi32>
    %8 = arith.cmpi sge, %6, %7 : vector<40x128xi32>
    %c12_i32 = arith.constant 12 : i32
    %9 = vector.broadcast %c12_i32 : i32 to vector<40x128xi32>
    %10 = arith.cmpi slt, %6, %9 : vector<40x128xi32>
    %11 = arith.andi %8, %10 : vector<40x128xi1>
    %cst_5 = arith.constant 0.000000e+00 : f32
    %12 = vector.broadcast %cst_5 : f32 to vector<40x128xf32>
    %13 = arith.maximumf %5, %12 : vector<40x128xf32>
    %14 = arith.select %11, %13, %5 : vector<40x128xi1>, vector<40x128xf32>
    %c0_6 = arith.constant 0 : index
    %c0_7 = arith.constant 0 : index
    %15 = vector.load %arg4[%c0_6, %c0_7] : memref<40x128xf32, #tpu.memory_space<vmem>>, vector<40x128xf32>
    tpu.vector_store %arg4[%c0_6, %c0_7], %14 {strides = array<i32>} : memref<40x128xf32, #tpu.memory_space<vmem>>, vector<40x128xf32>,
    return
  }
  func.func @transform_0(%arg0: i32) -> (i32, i32) {
    %c0_i32 = arith.constant 0 : i32
    %c0_i32_0 = arith.constant 0 : i32
    return %arg0, %c0_i32 : i32, i32
  }
  func.func @transform_1(%arg0: i32) -> (i32, i32) {
    %c0_i32 = arith.constant 0 : i32
    %c0_i32_0 = arith.constant 0 : i32
    %c0_i32_1 = arith.constant 0 : i32
    return %c0_i32, %c0_i32_0 : i32, i32
  }
  func.func @transform_2(%arg0: i32) -> (i32, i32) {
    %c0_i32 = arith.constant 0 : i32
    %c0_i32_0 = arith.constant 0 : i32
    %c0_i32_1 = arith.constant 0 : i32
    return %c0_i32, %c0_i32_0 : i32, i32
  }
  func.func @transform_3(%arg0: i32) -> (i32, i32) {
    %c0_i32 = arith.constant 0 : i32
    %c0_i32_0 = arith.constant 0 : i32
    return %arg0, %c0_i32 : i32, i32
  }
}

module attributes {stable_mosaic.version = 11 : i64} {
  func.func @_score_kernel(%arg0: i32, %arg1: i32, %arg2: memref<1x128x128xf32, #tpu.memory_space<vmem>>, %arg3: memref<1x1x128xf32, #tpu.memory_space<vmem>>) attributes {dimension_semantics = [#tpu.dimension_semantics<parallel>, #tpu.dimension_semantics<parallel>], iteration_bounds = array<i64: 2, 1>, scalar_prefetch = 0 : i64, scratch_operands = 0 : i64, tpu.core_type = #tpu.core_type<tc>, window_params = [{transform_indices = @transform_0, window_bounds = array<i64: 1, 128, 128>}, {transform_indices = @transform_1, window_bounds = array<i64: 1, 1, 128>}]} {
    %c0 = arith.constant 0 : index
    %c0_0 = arith.constant 0 : index
    %c0_1 = arith.constant 0 : index
    %0 = vector.load %arg2[%c0, %c0_0, %c0_1] : memref<1x128x128xf32, #tpu.memory_space<vmem>>, vector<1x128x128xf32>
    %1 = vector.shape_cast %0 : vector<1x128x128xf32> to vector<128x128xf32>
    %2 = tpu.iota {dimensions = array<i32: 1>} : vector<128x128xi32>
    %c8_i32 = arith.constant 8 : i32
    %3 = vector.broadcast %c8_i32 : i32 to vector<128x128xi32>
    %4 = arith.cmpi slt, %2, %3 : vector<128x128xi32>
    %cst = arith.constant -1.000000e+30 : f32
    %5 = vector.broadcast %cst : f32 to vector<128x128xf32>
    %6 = arith.select %4, %1, %5 : vector<128x128xi1>, vector<128x128xf32>
    %cst_2 = arith.constant dense<0xFF800000> : vector<128xf32>
    %7 = vector.multi_reduction <maximumf>, %6, %cst_2 [1] : vector<128x128xf32> to vector<128xf32>
    %8 = arith.negf %7 : vector<128xf32>
    %9 = math.exp %8 : vector<128xf32>
    %cst_3 = arith.constant 1.000000e+00 : f32
    %10 = vector.broadcast %cst_3 : f32 to vector<128xf32>
    %11 = arith.addf %10, %9 : vector<128xf32>
    %12 = arith.divf %10, %11 : vector<128xf32>
    %c12_i32 = arith.constant 12 : i32
    %13 = vector.broadcast %c12_i32 : i32 to vector<128x128xi32>
    %14 = arith.cmpi eq, %2, %13 : vector<128x128xi32>
    %cst_4 = arith.constant 0.000000e+00 : f32
    %15 = vector.broadcast %cst_4 : f32 to vector<128x128xf32>
    %16 = arith.select %14, %1, %15 : vector<128x128xi1>, vector<128x128xf32>
    %cst_5 = arith.constant dense<0.000000e+00> : vector<128xf32>
    %17 = vector.multi_reduction <add>, %16, %cst_5 [1] : vector<128x128xf32> to vector<128xf32>
    %18 = arith.negf %17 : vector<128xf32>
    %19 = math.exp %18 : vector<128xf32>
    %cst_6 = arith.constant 1.000000e+00 : f32
    %20 = vector.broadcast %cst_6 : f32 to vector<128xf32>
    %21 = arith.addf %20, %19 : vector<128xf32>
    %22 = arith.divf %20, %21 : vector<128xf32>
    %23 = arith.mulf %12, %22 : vector<128xf32>
    %24 = math.sqrt %23 : vector<128xf32>
    %c0_7 = arith.constant 0 : index
    %c0_8 = arith.constant 0 : index
    %c0_9 = arith.constant 0 : index
    %25 = vector.load %arg3[%c0_7, %c0_8, %c0_9] : memref<1x1x128xf32, #tpu.memory_space<vmem>>, vector<1x1x128xf32>
    %26 = vector.shape_cast %25 : vector<1x1x128xf32> to vector<128xf32>
    %27 = vector.shape_cast %24 : vector<128xf32> to vector<1x1x128xf32>
    tpu.vector_store %arg3[%c0_7, %c0_8, %c0_9], %27 {strides = array<i32>} : memref<1x1x128xf32, #tpu.memory_space<vmem>>, vector<1x1x128xf32>,
    return
  }
  func.func @transform_0(%arg0: i32, %arg1: i32) -> (i32, i32, i32) {
    %c0_i32 = arith.constant 0 : i32
    %c0_i32_0 = arith.constant 0 : i32
    return %arg0, %arg1, %c0_i32 : i32, i32, i32
  }
  func.func @transform_1(%arg0: i32, %arg1: i32) -> (i32, i32, i32) {
    %c0_i32 = arith.constant 0 : i32
    %c0_i32_0 = arith.constant 0 : i32
    return %arg0, %c0_i32, %arg1 : i32, i32, i32
  }
}

</mosaic_0001>

<bundles_post_ra>
// kernel: fcos_forward.5
= control target key start
LH: loop header
LB: loop body
LE: loop exit
PB: predicated region body
PF: predicated region fallthrough
CT: control target
= control target key end

     0   :  { %v183_v0 = vmov 0.0   ;;  %vm184_vm0 = vmmov 0   ;;  %vm129_vm1 = vcmask 257024   ;;  %s238_s1 = inlined_call_operand.vmem [shape: bf16[128,32], index: 1, kind: input, shape index: {}]   ;;  %s239_s0 = inlined_call_operand.vmem [shape: bf16[8,128], index: 0, kind: input, shape index: {}]   ;;  %s240_s2 = inlined_call_operand.vmem [shape: f32[1,32], index: 2, kind: input, shape index: {}]   ;;  %s241_s3 = inlined_call_operand.vmem [shape: bf16[8,32], index: 3, kind: output, shape index: {}]  }
   0x1   :  { %153 = vmatprep.subr.bf16.mxu0 %v183_v0  ;;  %v175_v1 = vld [vmem:[%s238_s1] sm:$0xff]   ;;  %169 = vmatprep.mubr.msk.bf16.mxu0 %vm184_vm0, %v183_v0  ;;  %v176_v2 = vld [vmem:[%s238_s1 + $0x8] sm:$0xff]   ;;  %v177_v3 = vld [vmem:[%s238_s1 + $0x10] sm:$0xff]  }
   0x2   :  { %154 = vmatpush3.bf16.msra.mxu0 %v175_v1  ;;  %v178_v4 = vld [vmem:[%s238_s1 + $0x18] sm:$0xff]   ;;  %v179_v5 = vld [vmem:[%s238_s1 + $0x20] sm:$0xff]   ;;  %v180_v6 = vld [vmem:[%s238_s1 + $0x28] sm:$0xff]  }
   0x3   :  { %155 = vmatprep.subr.bf16.mxu0 %v183_v0  ;;  %v181_v7 = vld [vmem:[%s238_s1 + $0x30] sm:$0xff]   ;;  %v182_v8 = vld [vmem:[%s238_s1 + $0x38] sm:$0xff]   ;;  %v15_v9 = vld [vmem:[%s239_s0] sm:$0xf] }
   0x4   :  { %v135_v10 = vld [vmem:[%s240_s2] ss:$0 sm:$0xff] }
   0x6   :  { %156 = vmatpush3.bf16.msra.mxu0 %v176_v2 }
   0x7   :  { %157 = vmatprep.subr.bf16.mxu0 %v183_v0 }
   0xa   :  { %158 = vmatpush3.bf16.msra.mxu0 %v177_v3 }
   0xb   :  { %159 = vmatprep.subr.bf16.mxu0 %v183_v0 }
   0xe   :  { %160 = vmatpush3.bf16.msra.mxu0 %v178_v4 }
   0xf   :  { %161 = vmatprep.subr.bf16.mxu0 %v183_v0 }
  0x12   :  { %162 = vmatpush3.bf16.msra.mxu0 %v179_v5 }
  0x13   :  { %163 = vmatprep.subr.bf16.mxu0 %v183_v0 }
  0x16   :  { %164 = vmatpush3.bf16.msra.mxu0 %v180_v6 }
  0x17   :  { %165 = vmatprep.subr.bf16.mxu0 %v183_v0 }
  0x1a   :  { %166 = vmatpush3.bf16.msra.mxu0 %v181_v7 }
  0x1b   :  { %167 = vmatprep.subr.bf16.mxu0 %v183_v0 }
  0x1e   :  { %168 = vmatpush3.bf16.msra.mxu0 %v182_v8 }
  0x21   :  { %170 = vmatmul.mubr.bf16.vlgmr.msra.gmra.mrb[0].mxu0 %v15_v9 }
  0xf4   :  { %v121_v11 = vpop.f32.mrb[0].mxu0 }
  0xf5   :  { %v122_v12 = vadd.f32 %v135_v10, %v121_v11  ;;  %v171_v13 = vpop.f32.mrb[1].mxu0 }
  0xf6   :  { %v124_v14 = vpop.f32.mrb[2].mxu0 }
  0xf7   :  { %v127_v15 = vmax.f32 %v122_v12, 0.0  ;;  %v172_v16 = vpop.f32.mrb[3].mxu0 }
  0xf9   :  { %v128_v17 = vpack.c.bf16 %v127_v15, %v127_v15 }
  0xfb   :  { %130 = vst.msk [vmem:[%s241_s3] sm:$0xf] %vm129_vm1, %v128_v17 }

// kernel: fcos_forward.4
= control target key start
LH: loop header
LB: loop body
LE: loop exit
PB: predicated region body
PF: predicated region fallthrough
CT: control target
= control target key end

     0   :  { %v295_v0 = vmov 0   ;;  %vm140_vm0 = vcmask 523264   ;;  %vm216_vm1 = vcmask 257024   ;;  %s403_s1 = inlined_call_operand.vmem [shape: bf16[192,32], index: 1, kind: input, shape index: {}]   ;;  %s404_s0 = inlined_call_operand.vmem [shape: bf16[32,192], index: 0, kind: input, shape index: {}]   ;;  %s405_s2 = inlined_call_operand.vmem [shape: f32[1,32], index: 2, kind: input, shape index: {}]   ;;  %s406_s3 = inlined_call_operand.vmem [shape: bf16[32,32], index: 3, kind: output, shape index: {}]  }
   0x1   :  { %147 = vmatprep.subr.bf16.mxu0 %v295_v0  ;;  %252 = vmatprep.subr.bf16.mxu1 %v295_v0  ;;  %v277_v1 = vld [vmem:[%s403_s1] sm:$0xff]   ;;  %v278_v2 = vld [vmem:[%s403_s1 + $0x8] sm:$0xff]   ;;  %v279_v3 = vld [vmem:[%s403_s1 + $0x10] sm:$0xff]  }
   0x2   :  { %148 = vmatpush1.bf16.msra.mxu0 %v277_v1  ;;  %264 = vmatpush1.bf16.msra.mxu1 %v277_v1  ;;  %v280_v4 = vld [vmem:[%s403_s1 + $0x18] sm:$0xff]   ;;  %v291_v5 = vld [vmem:[%s404_s0 + $0x4] ss:$8 sps:$4 sm:$0xff]   ;;  %v283_v9 = vld [vmem:[%s403_s1 + $0x30] sm:$0xff]  }
   0x3   :  { %149 = vmatprep.subr.bf16.mxu0 %v295_v0  ;;  %253 = vmatprep.subr.bf16.mxu1 %v295_v0  ;;  %v281_v6 = vld [vmem:[%s403_s1 + $0x20] sm:$0xff]   ;;  %v294_v7 = vld [vmem:[%s404_s0 + $0x14] ss:$8 sps:$4 sm:$0xff]   ;;  %v282_v8 = vld [vmem:[%s403_s1 + $0x28] sm:$0xff]  }
   0x4   :  { %242 = vmatprep.mubr.msk.bf16.mxu0 %vm140_vm0, %v291_v5  ;;  %243 = vmatprep.mubr.msk.bf16.mxu1 %vm140_vm0, %v294_v7  ;;  %v284_v10 = vld [vmem:[%s403_s1 + $0x38] sm:$0xff]   ;;  %v285_v11 = vld [vmem:[%s403_s1 + $0x40] sm:$0xff]   ;;  %v286_v12 = vld [vmem:[%s403_s1 + $0x48] sm:$0xff]  }
   0x5   :  { %v287_v13 = vld [vmem:[%s403_s1 + $0x50] sm:$0xff]   ;;  %v288_v14 = vld [vmem:[%s403_s1 + $0x58] sm:$0xff]   ;;  %v289_v15 = vld [vmem:[%s404_s0] ss:$8 sps:$4 sm:$0xff]  }
   0x6   :  { %150 = vmatpush1.bf16.msra.mxu0 %v278_v2  ;;  %265 = vmatpush1.bf16.msra.mxu1 %v278_v2  ;;  %v292_v16 = vld [vmem:[%s404_s0 + $0x10] ss:$8 sps:$4 sm:$0xff]   ;;  %v225_v17 = vld [vmem:[%s405_s2] ss:$0 sm:$0xff] }
   0x7   :  { %151 = vmatprep.subr.bf16.mxu0 %v295_v0  ;;  %254 = vmatprep.subr.bf16.mxu1 %v295_v0 }
   0xa   :  { %152 = vmatpush1.bf16.msra.mxu0 %v279_v3  ;;  %266 = vmatpush1.bf16.msra.mxu1 %v279_v3 }
   0xb   :  { %153 = vmatprep.subr.bf16.mxu0 %v295_v0  ;;  %255 = vmatprep.subr.bf16.mxu1 %v295_v0 }
   0xe   :  { %154 = vmatpush1.bf16.msra.mxu0 %v280_v4  ;;  %267 = vmatpush1.bf16.msra.mxu1 %v280_v4 }
   0xf   :  { %155 = vmatprep.subr.bf16.mxu0 %v295_v0  ;;  %256 = vmatprep.subr.bf16.mxu1 %v295_v0 }
  0x12   :  { %156 = vmatpush1.bf16.msra.mxu0 %v281_v6  ;;  %268 = vmatpush1.bf16.msra.mxu1 %v281_v6 }
  0x13   :  { %157 = vmatprep.subr.bf16.mxu0 %v295_v0  ;;  %257 = vmatprep.subr.bf16.mxu1 %v295_v0 }
  0x16   :  { %158 = vmatpush1.bf16.msra.mxu0 %v282_v8  ;;  %269 = vmatpush1.bf16.msra.mxu1 %v282_v8 }
  0x17   :  { %159 = vmatprep.subr.bf16.mxu0 %v295_v0  ;;  %258 = vmatprep.subr.bf16.mxu1 %v295_v0 }
  0x1a   :  { %160 = vmatpush1.bf16.msra.mxu0 %v283_v9  ;;  %270 = vmatpush1.bf16.msra.mxu1 %v283_v9 }
  0x1b   :  { %161 = vmatprep.subr.bf16.mxu0 %v295_v0  ;;  %259 = vmatprep.subr.bf16.mxu1 %v295_v0 }
  0x1e   :  { %162 = vmatpush1.bf16.msra.mxu0 %v284_v10  ;;  %271 = vmatpush1.bf16.msra.mxu1 %v284_v10 }
  0x1f   :  { %163 = vmatprep.subr.bf16.mxu0 %v295_v0  ;;  %260 = vmatprep.subr.bf16.mxu1 %v295_v0 }
  0x22   :  { %164 = vmatpush1.bf16.msra.mxu0 %v285_v11  ;;  %272 = vmatpush1.bf16.msra.mxu1 %v285_v11 }
  0x23   :  { %165 = vmatprep.subr.bf16.mxu0 %v295_v0  ;;  %261 = vmatprep.subr.bf16.mxu1 %v295_v0 }
  0x26   :  { %166 = vmatpush1.bf16.msra.mxu0 %v286_v12  ;;  %273 = vmatpush1.bf16.msra.mxu1 %v286_v12 }
  0x27   :  { %167 = vmatprep.subr.bf16.mxu0 %v295_v0  ;;  %262 = vmatprep.subr.bf16.mxu1 %v295_v0 }
  0x2a   :  { %168 = vmatpush1.bf16.msra.mxu0 %v287_v13  ;;  %274 = vmatpush1.bf16.msra.mxu1 %v287_v13 }
  0x2b   :  { %169 = vmatprep.subr.bf16.mxu0 %v295_v0  ;;  %263 = vmatprep.subr.bf16.mxu1 %v295_v0 }
  0x2e   :  { %170 = vmatpush1.bf16.msra.mxu0 %v288_v14  ;;  %275 = vmatpush1.bf16.msra.mxu1 %v288_v14 }
  0x31   :  { %180 = vmatmul.mubr.bf16.vlgmr.msra.gmra.mrb[0].mxu0 %v289_v15  ;;  %188 = vmatmul.mubr.bf16.vlgmr.msra.gmra.mrb[0].mxu1 %v292_v16 }
 0x104   :  { %v181_v18 = vpop.f32.mrb[0].mxu0  ;;  %v189_v19 = vpop.f32.mrb[0].mxu1 }
 0x105   :  { %v182_v20 = vadd.f32 %v225_v17, %v181_v18  ;;  %v190_v21 = vadd.f32 %v225_v17, %v189_v19  ;;  %v183_v22 = vpop.f32.mrb[1].mxu0  ;;  %v191_v23 = vpop.f32.mrb[1].mxu1 }
 0x106   :  { %v184_v24 = vpop.f32.mrb[2].mxu0  ;;  %v192_v25 = vpop.f32.mrb[2].mxu1 }
 0x107   :  { %v196_v26 = vmax.f32 %v182_v20, 0.0  ;;  %v198_v27 = vmax.f32 %v190_v21, 0.0  ;;  %v185_v28 = vadd.f32 %v225_v17, %v184_v24  ;;  %v193_v29 = vadd.f32 %v225_v17, %v192_v25  ;;  %v186_v30 = vpop.f32.mrb[3].mxu0  ;;  %v194_v31 = vpop.f32.mrb[3].mxu1 }
 0x109   :  { %v248_v32 = vpack.c.bf16 %v196_v26, %v196_v26  ;;  %v250_v33 = vpack.c.bf16 %v198_v27, %v198_v27  ;;  %v197_v34 = vmax.f32 %v185_v28, 0.0  ;;  %v199_v35 = vmax.f32 %v193_v29, 0.0 }
 0x10b   :  { %217 = vst.msk [vmem:[%s406_s3] sm:$0xf] %vm216_vm1, %v248_v32  ;;  %219 = vst.msk [vmem:[%s406_s3 + $0x8] sm:$0xf] %vm216_vm1, %v250_v33  ;;  %v249_v36 = vpack.c.bf16 %v197_v34, %v197_v34  ;;  %v251_v37 = vpack.c.bf16 %v199_v35, %v199_v35 }
 0x10d   :  { %218 = vst.msk [vmem:[%s406_s3 + $0x4] sm:$0xf] %vm216_vm1, %v249_v36  ;;  %220 = vst.msk [vmem:[%s406_s3 + $0xc] sm:$0xf] %vm216_vm1, %v251_v37 }

// kernel: fcos_forward.6
= control target key start
LH: loop header
LB: loop body
LE: loop exit
PB: predicated region body
PF: predicated region fallthrough
CT: control target
= control target key end

     0   :  { %v187_v0 = vmov 0.0   ;;  %vm188_vm0 = vmmov 0   ;;  %vm56_vm1 = vcmask 261120   ;;  %v122_v6 = vlaneseq  ;;  %s259_s1 = inlined_call_operand.vmem [shape: bf16[32,128], index: 1, kind: input, shape index: {}]   ;;  %s260_s0 = inlined_call_operand.vmem [shape: bf16[40,32], index: 0, kind: input, shape index: {}]   ;;  %s261_s2 = inlined_call_operand.vmem [shape: f32[1,128], index: 2, kind: input, shape index: {}]   ;;  %s262_s3 = inlined_call_operand.vmem [shape: f32[40,128], index: 3, kind: output, shape index: {}]  }
   0x1   :  { %176 = vmatprep.subr.bf16.mxu1 %v187_v0  ;;  %v182_v1 = vld [vmem:[%s259_s1] sm:$0xff]   ;;  %160 = vmatprep.subr.bf16.mxu0 %v187_v0  ;;  %v183_v2 = vld [vmem:[%s259_s1 + $0x8] sm:$0xff]   ;;  %v186_v5 = vld [vmem:[%s260_s0 + $0x10] ss:$0 sps:$4 sm:$0xff]  }
   0x2   :  { %168 = vmatprep.mubr.msk.bf16.mxu1 %vm188_vm0, %v187_v0  ;;  %164 = vmatprep.mubr.msk.bf16.mxu0 %vm188_vm0, %v187_v0  ;;  %v184_v3 = vld [vmem:[%s260_s0 + $0x8] sm:$0xff]   ;;  %v185_v4 = vld [vmem:[%s260_s0] sm:$0xff]   ;;  %v123_v7 = vand.u32 127, %v122_v6 }
   0x3   :  { %178 = vmatpush3.bf16.msra.mxu1 %v182_v1  ;;  %161 = vmatpush3.bf16.msra.mxu0 %v182_v1  ;;  %v146_v8 = vld [vmem:[%s261_s2] ss:$0 sm:$0xff] }
   0x4   :  { %177 = vmatprep.subr.bf16.mxu1 %v187_v0  ;;  %162 = vmatprep.subr.bf16.mxu0 %v187_v0  ;;  %vm124_vm2 = vcmp.ge.s32.totalorder %v123_v7, 8  ;;  %vm125_vm3 = vcmp.lt.s32.totalorder %v123_v7, 12 }
   0x5   :  { %vm230_vm4 = vmand %vm124_vm2, %vm125_vm3 }
   0x7   :  { %179 = vmatpush3.bf16.msra.mxu1 %v183_v2  ;;  %163 = vmatpush3.bf16.msra.mxu0 %v183_v2 }
   0xa   :  { %169 = vmatmul.mubr.msk.bf16.vlgmr.msra.gmra.mrb[0].mxu1 %vm56_vm1, %v184_v3  ;;  %165 = vmatmul.mubr.msk.bf16.vlgmr.msra.gmra.mrb[0].mxu0 %vm56_vm1, %v185_v4 }
   0xb   :  { %172 = vmatprep.mubr.msk.bf16.mxu1 %vm188_vm0, %v187_v0 }
  0x12   :  { %173 = vmatmul.mubr.msk.bf16.gmra.mrb[4].mxu1 %vm56_vm1, %v186_v5 }
  0xdd   :  { %v108_v9 = vpop.f32.mrb[0].mxu1  ;;  %v100_v10 = vpop.f32.mrb[0].mxu0 }
  0xde   :  { %v109_v11 = vadd.f32 %v146_v8, %v108_v9  ;;  %v170_v12 = vpop.f32.mrb[1].mxu1  ;;  %v101_v13 = vadd.f32 %v146_v8, %v100_v10  ;;  %v166_v14 = vpop.f32.mrb[1].mxu0 }
  0xdf   :  { %v111_v16 = vpop.f32.mrb[2].mxu1  ;;  %v103_v17 = vpop.f32.mrb[2].mxu0 }
  0xe0   :  { %v129_v18 = vmax.f32 %v109_v11, 0.0  ;;  %v127_v19 = vmax.f32 %v101_v13, 0.0  ;;  %v112_v20 = vadd.f32 %v146_v8, %v111_v16  ;;  %v171_v21 = vpop.f32.mrb[3].mxu1  ;;  %v104_v22 = vadd.f32 %v146_v8, %v103_v17  ;;  %v167_v23 = vpop.f32.mrb[3].mxu0 }
  0xe2   :  { %v134_v24 = vsel %vm230_vm4, %v129_v18, %v109_v11  ;;  %v132_v25 = vsel %vm230_vm4, %v127_v19, %v101_v13  ;;  %v130_v26 = vmax.f32 %v112_v20, 0.0  ;;  %v128_v27 = vmax.f32 %v104_v22, 0.0 }
  0xe3   :  { %139 = vst [vmem:[%s262_s3 + $0x10] sm:$0xff] %v134_v24  ;;  %137 = vst [vmem:[%s262_s3] sm:$0xff] %v132_v25 }
  0xe4   :  { %v135_v28 = vsel %vm230_vm4, %v130_v26, %v112_v20  ;;  %v133_v29 = vsel %vm230_vm4, %v128_v27, %v104_v22 }
  0xe5   :  { %140 = vst [vmem:[%s262_s3 + $0x18] sm:$0xff] %v135_v28  ;;  %138 = vst [vmem:[%s262_s3 + $0x8] sm:$0xff] %v133_v29  ;;  %v116_v30 = vpop.f32.mrb[4].mxu1 }
  0xe6   :  { %v117_v31 = vadd.f32 %v146_v8, %v116_v30  ;;  %v174_v32 = vpop.f32.mrb[5].mxu1 }
  0xe7   :  { %v119_v33 = vpop.f32.mrb[6].mxu1 }
  0xe8   :  { %v131_v34 = vmax.f32 %v117_v31, 0.0  ;;  %v175_v35 = vpop.f32.mrb[7].mxu1 }
  0xea   :  { %v136_v36 = vsel %vm230_vm4, %v131_v34, %v117_v31 }
  0xeb   :  { %141 = vst [vmem:[%s262_s3 + $0x20] sm:$0xff] %v136_v36 }

// kernel: fcos_forward.7
= control target key start
LH: loop header
LB: loop body
LE: loop exit
PB: predicated region body
PF: predicated region fallthrough
CT: control target
= control target key end

     0   :  { %s1043_s6 = smov 0   ;;  %s1045_s7 = smov 0   ;;  %s1474_s0 = inlined_call_operand.vmem [shape: f32[2,128,128], index: 0, kind: input, shape index: {}]   ;;  %s1475_s1 = inlined_call_operand.vmem [shape: f32[2,1,128], index: 1, kind: output, shape index: {}]  }
   0x1   :  { %s1047_s8 = smov 0  }
   0x2 LB: > { %s23_s9 = sadd.s32 1, %s1027_s7  ;;  %p787_p0 = scmp.ge.s32.totalorder %s1031_s8, 1  ;;  %s1031_s8 = sphi %s1047_s8, %s11_s8   ;;  %s1027_s7 = sphi %s1045_s7, %s1477_s7   ;;  %s1023_s6 = sphi %s1043_s6, %s1476_s6  }
   0x3   : > { %p25_p1 = scmp.ge.s32.totalorder %s23_s9, 2  ;;  %p108_p2 = scmp.lt.s32.totalorder %s1031_s8, 3 }
   0x5   : > { %s1479_s9 = smov (%p25_p1, %s23_s9), 0  ;;  %p109_p3 = pnand %p787_p0, %p108_p2 }
   0x6   : > { %p134_p4 = scmp.lt.s32.totalorder (!%p109_p3), %s1023_s6, 1  ;;  %v165_v0 = vlaneseq (!%p109_p3)  ;;  %vm610_vm8 = vcmask (!%p109_p3), 130112   ;;  %vm617_vm11 = vcmask (!%p109_p3), 195712   ;;  %vm624_vm13 = vcmask (!%p109_p3), 261312  }
   0x7   : > { %112 = sbr.rel (%p109_p3) target bundleno = 281 (0x119), region = 24  ;;  %vm631_vm15 = vcmask (!%p109_p3), 326912  }
   0x8   : > { %v1064_v1 = vand.u32 (!%p109_p3), 127, %v165_v0 }
   0xa   : > { %vm312_vm0 = vcmp.eq.s32.totalorder (!%p109_p3), %v1064_v1, 12  ;;  %vm167_vm1 = vcmp.lt.s32.totalorder (!%p109_p3), %v1064_v1, 8 }
   0xe   : > { %s1481_s6 = smov (!%p134_p4, %s1023_s6), 1 }
   0xf   : > { %s824_s10 = sshll.u32 %s1481_s6, 7  ;;  %s148_s16 = scalar_lea.vmem %s1475_s1, %s1481_s6 }
  0x10   : > { %s1072_s13 = scalar_lea.vmem %s1474_s0, %s824_s10 }
  0x11   : > { %v149_v2 = vld [vmem:[%s1072_s13] sm:$0xff]  ;;  %v150_v3 = vld [vmem:[%s1072_s13 + $0x8] sm:$0xff]  ;;  %v151_v8 = vld [vmem:[%s1072_s13 + $0x10] sm:$0xff] }
  0x12   : > { %v313_v4 = vsel %vm312_vm0, %v149_v2, 0.0  ;;  %v168_v5 = vsel %vm167_vm1, %v149_v2, -1e+30  ;;  %v314_v6 = vsel %vm312_vm0, %v150_v3, 0.0  ;;  %v169_v7 = vsel %vm167_vm1, %v150_v3, -1e+30 }
  0x13   : > { %329 = vadd.xlane.f32.xlu1 %v313_v4  ;;  %184 = vmax.xlane.f32.xlu0 %v168_v5  ;;  %v315_v9 = vsel %vm312_vm0, %v151_v8, 0.0  ;;  %v170_v10 = vsel %vm167_vm1, %v151_v8, -1e+30  ;;  %v152_v11 = vld [vmem:[%s1072_s13 + $0x18] sm:$0xff]  ;;  %v153_v14 = vld [vmem:[%s1072_s13 + $0x20] sm:$0xff]  ;;  %v154_v17 = vld [vmem:[%s1072_s13 + $0x28] sm:$0xff] }
  0x14   : > { %v316_v12 = vsel %vm312_vm0, %v152_v11, 0.0  ;;  %v171_v13 = vsel %vm167_vm1, %v152_v11, -1e+30  ;;  %v317_v15 = vsel %vm312_vm0, %v153_v14, 0.0  ;;  %v172_v16 = vsel %vm167_vm1, %v153_v14, -1e+30 }
  0x15   : > { %v318_v18 = vsel %vm312_vm0, %v154_v17, 0.0  ;;  %v173_v19 = vsel %vm167_vm1, %v154_v17, -1e+30  ;;  %v155_v20 = vld [vmem:[%s1072_s13 + $0x30] sm:$0xff]  ;;  %v156_v23 = vld [vmem:[%s1072_s13 + $0x38] sm:$0xff]  ;;  %v157_v26 = vld [vmem:[%s1072_s13 + $0x40] sm:$0xff] }
  0x16   : > { %v319_v21 = vsel %vm312_vm0, %v155_v20, 0.0  ;;  %v174_v22 = vsel %vm167_vm1, %v155_v20, -1e+30  ;;  %v320_v24 = vsel %vm312_vm0, %v156_v23, 0.0  ;;  %v175_v25 = vsel %vm167_vm1, %v156_v23, -1e+30 }
  0x17   : > { %331 = vadd.xlane.f32.xlu1 %v314_v6  ;;  %186 = vmax.xlane.f32.xlu0 %v169_v7  ;;  %v321_v27 = vsel %vm312_vm0, %v157_v26, 0.0  ;;  %v176_v28 = vsel %vm167_vm1, %v157_v26, -1e+30  ;;  %v158_v29 = vld [vmem:[%s1072_s13 + $0x48] sm:$0xff]  ;;  %v159_v32 = vld [vmem:[%s1072_s13 + $0x50] sm:$0xff]  ;;  %v160_v35 = vld [vmem:[%s1072_s13 + $0x58] sm:$0xff] }
  0x18   : > { %v322_v30 = vsel %vm312_vm0, %v158_v29, 0.0  ;;  %v177_v31 = vsel %vm167_vm1, %v158_v29, -1e+30  ;;  %v323_v33 = vsel %vm312_vm0, %v159_v32, 0.0  ;;  %v178_v34 = vsel %vm167_vm1, %v159_v32, -1e+30 }
  0x19   : > { %v324_v36 = vsel %vm312_vm0, %v160_v35, 0.0  ;;  %v179_v37 = vsel %vm167_vm1, %v160_v35, -1e+30  ;;  %v161_v38 = vld [vmem:[%s1072_s13 + $0x60] sm:$0xff]  ;;  %v162_v41 = vld [vmem:[%s1072_s13 + $0x68] sm:$0xff]  ;;  %v163_v44 = vld [vmem:[%s1072_s13 + $0x70] sm:$0xff] }
  0x1a   : > { %v325_v39 = vsel %vm312_vm0, %v161_v38, 0.0  ;;  %v180_v40 = vsel %vm167_vm1, %v161_v38, -1e+30  ;;  %v326_v42 = vsel %vm312_vm0, %v162_v41, 0.0  ;;  %v181_v43 = vsel %vm167_vm1, %v162_v41, -1e+30 }
  0x1b   : > { %333 = vadd.xlane.f32.xlu1 %v315_v9  ;;  %188 = vmax.xlane.f32.xlu0 %v170_v10  ;;  %v327_v45 = vsel %vm312_vm0, %v163_v44, 0.0  ;;  %v182_v46 = vsel %vm167_vm1, %v163_v44, -1e+30  ;;  %v164_v47 = vld [vmem:[%s1072_s13 + $0x78] sm:$0xff] }
  0x1c   : > { %v328_v48 = vsel %vm312_vm0, %v164_v47, 0.0  ;;  %v183_v49 = vsel %vm167_vm1, %v164_v47, -1e+30  ;;  %vm638_vm0 = vcmask 392512  }
  0x1f   : > { %335 = vadd.xlane.f32.xlu1 %v316_v12  ;;  %190 = vmax.xlane.f32.xlu0 %v171_v13 }
  0x23   : > { %337 = vadd.xlane.f32.xlu1 %v317_v15  ;;  %192 = vmax.xlane.f32.xlu0 %v172_v16 }
  0x27   : > { %339 = vadd.xlane.f32.xlu1 %v318_v18  ;;  %194 = vmax.xlane.f32.xlu0 %v173_v19 }
  0x2b   : > { %341 = vadd.xlane.f32.xlu1 %v319_v21  ;;  %196 = vmax.xlane.f32.xlu0 %v174_v22 }
  0x2f   : > { %343 = vadd.xlane.f32.xlu1 %v320_v24  ;;  %198 = vmax.xlane.f32.xlu0 %v175_v25 }
  0x33   : > { %345 = vadd.xlane.f32.xlu1 %v321_v27  ;;  %200 = vmax.xlane.f32.xlu0 %v176_v28 }
  0x37   : > { %347 = vadd.xlane.f32.xlu1 %v322_v30  ;;  %202 = vmax.xlane.f32.xlu0 %v177_v31 }
  0x3b   : > { %349 = vadd.xlane.f32.xlu1 %v323_v33  ;;  %204 = vmax.xlane.f32.xlu0 %v178_v34 }
  0x3f   : > { %351 = vadd.xlane.f32.xlu1 %v324_v36  ;;  %206 = vmax.xlane.f32.xlu0 %v179_v37 }
  0x43   : > { %353 = vadd.xlane.f32.xlu1 %v325_v39  ;;  %208 = vmax.xlane.f32.xlu0 %v180_v40 }
  0x47   : > { %355 = vadd.xlane.f32.xlu1 %v326_v42  ;;  %210 = vmax.xlane.f32.xlu0 %v181_v43 }
  0x4b   : > { %357 = vadd.xlane.f32.xlu1 %v327_v45  ;;  %212 = vmax.xlane.f32.xlu0 %v182_v46 }
  0x4f   : > { %359 = vadd.xlane.f32.xlu1 %v328_v48  ;;  %214 = vmax.xlane.f32.xlu0 %v183_v49 }
  0xa0   : > { %v330_v50 = vpop.xlane.xlu1 %329  ;;  %v185_v51 = vpop.xlane.xlu0 %184 }
  0xa1   : > { %v806_v52 = vmul.f32 -1.442695, %v330_v50  ;;  %v790_v53 = vmul.f32 -1.442695, %v185_v51 }
  0xa3   : > { %849 = vpow2.f32 %v806_v52 }
  0xa4   : > { %851 = vpow2.f32 %v790_v53  ;;  %v332_v54 = vpop.xlane.xlu1 %331  ;;  %v187_v55 = vpop.xlane.xlu0 %186 }
  0xa5   : > { %v807_v56 = vmul.f32 -1.442695, %v332_v54  ;;  %v791_v57 = vmul.f32 -1.442695, %v187_v55 }
  0xa7   : > { %853 = vpow2.f32 %v807_v56 }
  0xa8   : > { %855 = vpow2.f32 %v791_v57  ;;  %v334_v58 = vpop.xlane.xlu1 %333  ;;  %v189_v59 = vpop.xlane.xlu0 %188 }
  0xa9   : > { %v808_v60 = vmul.f32 -1.442695, %v334_v58  ;;  %v792_v61 = vmul.f32 -1.442695, %v189_v59 }
  0xab   : > { %857 = vpow2.f32 %v808_v60 }
  0xac   : > { %859 = vpow2.f32 %v792_v61  ;;  %v336_v62 = vpop.xlane.xlu1 %335  ;;  %v191_v63 = vpop.xlane.xlu0 %190 }
  0xad   : > { %v850_v2 = vpop.eup %849  ;;  %v809_v3 = vmul.f32 -1.442695, %v336_v62  ;;  %v793_v6 = vmul.f32 -1.442695, %v191_v63 }
  0xae   : > { %v852_v4 = vpop.eup %851  ;;  %v409_v5 = vadd.f32 1.0, %v850_v2 }
  0xaf   : > { %861 = vpow2.f32 %v809_v3  ;;  %v264_v7 = vadd.f32 1.0, %v852_v4 }
  0xb0   : > { %v338_v8 = vpop.xlane.xlu1 %337  ;;  %v193_v9 = vpop.xlane.xlu0 %192  ;;  %863 = vrcp.f32 %v409_v5 }
  0xb1   : > { %v854_v10 = vpop.eup %853  ;;  %v810_v11 = vmul.f32 -1.442695, %v338_v8  ;;  %865 = vpow2.f32 %v793_v6  ;;  %v794_v14 = vmul.f32 -1.442695, %v193_v9 }
  0xb2   : > { %v856_v12 = vpop.eup %855  ;;  %v410_v13 = vadd.f32 1.0, %v854_v10 }
  0xb3   : > { %867 = vpow2.f32 %v810_v11  ;;  %v265_v15 = vadd.f32 1.0, %v856_v12 }
  0xb4   : > { %869 = vrcp.f32 %v264_v7  ;;  %v340_v16 = vpop.xlane.xlu1 %339  ;;  %v195_v17 = vpop.xlane.xlu0 %194 }
  0xb5   : > { %v858_v18 = vpop.eup %857  ;;  %871 = vrcp.f32 %v410_v13  ;;  %v811_v19 = vmul.f32 -1.442695, %v340_v16  ;;  %v795_v22 = vmul.f32 -1.442695, %v195_v17 }
  0xb6   : > { %v860_v20 = vpop.eup %859  ;;  %v411_v21 = vadd.f32 1.0, %v858_v18  ;;  %873 = vpow2.f32 %v794_v14 }
  0xb7   : > { %v266_v23 = vadd.f32 1.0, %v860_v20  ;;  %875 = vpow2.f32 %v811_v19 }
  0xb8   : > { %877 = vrcp.f32 %v265_v15  ;;  %v342_v24 = vpop.xlane.xlu1 %341  ;;  %v197_v25 = vpop.xlane.xlu0 %196 }
  0xb9   : > { %v862_v26 = vpop.eup %861  ;;  %879 = vrcp.f32 %v411_v21  ;;  %v812_v27 = vmul.f32 -1.442695, %v342_v24  ;;  %v796_v30 = vmul.f32 -1.442695, %v197_v25 }
  0xba   : > { %v412_v28 = vadd.f32 1.0, %v862_v26  ;;  %881 = vpow2.f32 %v795_v22  ;;  %v864_v29 = vpop.eup %863 }
  0xbb   : > { %883 = vrcp.f32 %v266_v23  ;;  %v866_v31 = vpop.eup %865 }
  0xbc   : > { %885 = vpow2.f32 %v812_v27  ;;  %v344_v32 = vpop.xlane.xlu1 %343  ;;  %v199_v33 = vpop.xlane.xlu0 %198  ;;  %v267_v35 = vadd.f32 1.0, %v866_v31 }
  0xbd   : > { %v868_v34 = vpop.eup %867  ;;  %887 = vrcp.f32 %v412_v28  ;;  %v813_v37 = vmul.f32 -1.442695, %v344_v32  ;;  %v797_v45 = vmul.f32 -1.442695, %v199_v33 }
  0xbe   : > { %v870_v36 = vpop.eup %869  ;;  %v413_v39 = vadd.f32 1.0, %v868_v34  ;;  %889 = vpow2.f32 %v796_v30 }
  0xbf   : > { %v872_v38 = vpop.eup %871  ;;  %891 = vrcp.f32 %v267_v35  ;;  %v1154_v50 = vmul.f32 %v870_v36, %v864_v29 }
  0xc0   : > { %v874_v40 = vpop.eup %873  ;;  %v346_v41 = vpop.xlane.xlu1 %345  ;;  %893 = vpow2.f32 %v813_v37 }
  0xc1   : > { %v201_v42 = vpop.xlane.xlu0 %200  ;;  %v876_v43 = vpop.eup %875  ;;  %v268_v44 = vadd.f32 1.0, %v874_v40  ;;  %895 = vrcp.f32 %v413_v39  ;;  %v814_v57 = vmul.f32 -1.442695, %v346_v41  ;;  %vm475_vm2 = vcmp.eq.f32.partialorder %v1154_v50, inf }
  0xc2   : > { %v878_v46 = vpop.eup %877  ;;  %v414_v48 = vadd.f32 1.0, %v876_v43  ;;  %v798_v58 = vmul.f32 -1.442695, %v201_v42  ;;  %vm477_vm3 = vcmp.eq.f32.partialorder %v1154_v50, 0.0 }
  0xc3   : > { %v880_v47 = vpop.eup %879  ;;  %897 = vrcp.f32 %v268_v44  ;;  %v1156_v54 = vmul.f32 %v878_v46, %v872_v38  ;;  %v1181_v46 = vshrl.u32 %v165_v0, 7 }
  0xc4   : > { %v882_v49 = vpop.eup %881  ;;  %v348_v51 = vpop.xlane.xlu1 %347  ;;  %899 = vpow2.f32 %v797_v45 }
  0xc5   : > { %v203_v52 = vpop.xlane.xlu0 %202  ;;  %v884_v53 = vpop.eup %883  ;;  %v269_v55 = vadd.f32 1.0, %v882_v49  ;;  %901 = vrcp.f32 %v414_v48  ;;  %v815_v4 = vmul.f32 -1.442695, %v348_v51  ;;  %v1184_v49 = vadd.s32 4294967288, %v1064_v1 }
  0xc6   : > { %v886_v56 = vpop.eup %885  ;;  %v1159_v60 = vmul.f32 %v884_v53, %v880_v47  ;;  %v799_v5 = vmul.f32 -1.442695, %v203_v52  ;;  %v603_v0 = vsub.s32 %v1064_v1, %v1181_v46  ;;  %vm482_vm4 = vcmp.eq.f32.partialorder %v1156_v54, inf }
  0xc7   : > { %903 = vrcp.f32 %v269_v55  ;;  %v888_v59 = vpop.eup %887  ;;  %v415_v2 = vadd.f32 1.0, %v886_v56  ;;  %vm484_vm5 = vcmp.eq.f32.partialorder %v1156_v54, 0.0 }
  0xc8   : > { %905 = vrsqrt.f32 %v1154_v50  ;;  %v350_v61 = vpop.xlane.xlu1 %349  ;;  %v890_v63 = vpop.eup %889  ;;  %vm489_vm6 = vcmp.eq.f32.partialorder %v1159_v60, inf  ;;  %vm491_vm7 = vcmp.eq.f32.partialorder %v1159_v60, 0.0 }
  0xc9   : > { %v205_v62 = vpop.xlane.xlu0 %204  ;;  %907 = vrsqrt.f32 %v1156_v54  ;;  %v892_v3 = vpop.eup %891  ;;  %v270_v7 = vadd.f32 1.0, %v890_v63  ;;  %v816_v13 = vmul.f32 -1.442695, %v350_v61  ;;  %v1195_v63 = vadd.s32 4294967280, %v1064_v1 }
  0xca   : > { %909 = vpow2.f32 %v814_v57  ;;  %v894_v6 = vpop.eup %893  ;;  %v1163_v10 = vmul.f32 %v892_v3, %v888_v59  ;;  %v800_v15 = vmul.f32 -1.442695, %v205_v62  ;;  %v608_v62 = vsub.s32 %v1184_v49, %v1181_v46 }
  0xcb   : > { %911 = vpow2.f32 %v798_v58  ;;  %v896_v9 = vpop.eup %895  ;;  %v416_v17 = vadd.f32 1.0, %v894_v6  ;;  %v1203_v6 = vadd.s32 4294967264, %v1064_v1 }
  0xcc   : > { %913 = vrsqrt.f32 %v1159_v60  ;;  %v352_v8 = vpop.xlane.xlu1 %351  ;;  %vm496_vm9 = vcmp.eq.f32.partialorder %v1163_v10, inf  ;;  %vm498_vm10 = vcmp.eq.f32.partialorder %v1163_v10, 0.0 }
  0xcd   : > { %915 = vrcp.f32 %v415_v2  ;;  %v207_v11 = vpop.xlane.xlu0 %206  ;;  %v898_v12 = vpop.eup %897  ;;  %v817_v22 = vmul.f32 -1.442695, %v352_v8 }
  0xce   : > { %917 = vpow2.f32 %v815_v4  ;;  %v900_v14 = vpop.eup %899  ;;  %v1166_v20 = vmul.f32 %v898_v12, %v896_v9  ;;  %v801_v29 = vmul.f32 -1.442695, %v207_v11  ;;  %v1209_v9 = vadd.s32 4294967248, %v1064_v1 }
  0xcf   : > { %919 = vpow2.f32 %v799_v5  ;;  %v902_v16 = vpop.eup %901  ;;  %v271_v24 = vadd.f32 1.0, %v900_v14  ;;  %v1200_v5 = vadd.s32 4294967272, %v1064_v1  ;;  %v1212_v11 = vadd.s32 4294967240, %v1064_v1 }
  0xd0   : > { %921 = vrcp.f32 %v270_v7  ;;  %v354_v18 = vpop.xlane.xlu1 %353  ;;  %v1206_v7 = vadd.s32 4294967256, %v1064_v1  ;;  %v1215_v14 = vadd.s32 4294967232, %v1064_v1  ;;  %vm503_vm12 = vcmp.eq.f32.partialorder %v1166_v20, inf }
  0xd1   : > { %v904_v19 = vpop.eup %903  ;;  %923 = vrsqrt.f32 %v1163_v10  ;;  %v209_v25 = vpop.xlane.xlu0 %208  ;;  %v818_v32 = vmul.f32 -1.442695, %v354_v18  ;;  %v615_v18 = vsub.s32 %v1195_v63, %v1181_v46  ;;  %vm505_vm14 = vcmp.eq.f32.partialorder %v1166_v20, 0.0 }
  0xd2   : > { %v1168_v21 = vpop.eup %905  ;;  %925 = vpow2.f32 %v816_v13  ;;  %v1172_v27 = vmul.f32 %v904_v19, %v902_v16  ;;  %v802_v38 = vmul.f32 -1.442695, %v209_v25 }
  0xd3   : > { %v1170_v23 = vpop.eup %907  ;;  %927 = vpow2.f32 %v800_v15 }
  0xd4   : > { %v910_v26 = vpop.eup %909  ;;  %929 = vrcp.f32 %v416_v17  ;;  %v356_v30 = vpop.xlane.xlu1 %355  ;;  %vm510_vm1 = vcmp.eq.f32.partialorder %v1172_v27, inf }
  0xd5   : > { %v912_v28 = vpop.eup %911  ;;  %931 = vrsqrt.f32 %v1166_v20  ;;  %v417_v34 = vadd.f32 1.0, %v910_v26  ;;  %v211_v39 = vpop.xlane.xlu0 %210  ;;  %v819_v47 = vmul.f32 -1.442695, %v356_v30  ;;  %v622_v26 = vsub.s32 %v1200_v5, %v1181_v46 }
  0xd6   : > { %v1175_v31 = vpop.eup %913  ;;  %933 = vpow2.f32 %v817_v22  ;;  %v272_v36 = vadd.f32 1.0, %v912_v28  ;;  %v803_v51 = vmul.f32 -1.442695, %v211_v39  ;;  %v1222_v22 = vadd.s32 4294967224, %v1064_v1 }
  0xd7   : > { %v916_v33 = vpop.eup %915  ;;  %935 = vrcp.f32 %v271_v24  ;;  %v629_v28 = vsub.s32 %v1203_v6, %v1181_v46 }
  0xd8   : > { %v918_v35 = vpop.eup %917  ;;  %937 = vrsqrt.f32 %v1172_v27  ;;  %v358_v44 = vpop.xlane.xlu1 %357 }
  0xd9   : > { %v920_v37 = vpop.eup %919  ;;  %939 = vpow2.f32 %v801_v29  ;;  %v418_v41 = vadd.f32 1.0, %v918_v35  ;;  %v213_v56 = vpop.xlane.xlu0 %212  ;;  %v820_v59 = vmul.f32 -1.442695, %v358_v44  ;;  %v636_v29 = vsub.s32 %v1206_v7, %v1181_v46 }
  0xda   : > { %v922_v40 = vpop.eup %921  ;;  %941 = vpow2.f32 %v818_v32  ;;  %v273_v43 = vadd.f32 1.0, %v920_v37  ;;  %v804_v12 = vmul.f32 -1.442695, %v213_v56  ;;  %v643_v32 = vsub.s32 %v1209_v9, %v1181_v46 }
  0xdb   : > { %v1178_v42 = vpop.eup %923  ;;  %943 = vrcp.f32 %v417_v34  ;;  %v1219_v19 = vmul.f32 %v922_v40, %v916_v33  ;;  %v650_v33 = vsub.s32 %v1212_v11, %v1181_v46  ;;  %v474_v40 = vmul.f32 %v1168_v21, %v1154_v50 }
  0xdc   : > { %v926_v45 = vpop.eup %925  ;;  %945 = vrcp.f32 %v272_v36  ;;  %v360_v3 = vpop.xlane.xlu1 %359  ;;  %v657_v36 = vsub.s32 %v1215_v14, %v1181_v46 }
  0xdd   : > { %v928_v48 = vpop.eup %927  ;;  %947 = vpow2.f32 %v802_v38  ;;  %v419_v53 = vadd.f32 1.0, %v926_v45  ;;  %v821_v16 = vmul.f32 -1.442695, %v360_v3  ;;  %v215_v24 = vpop.xlane.xlu0 %214  ;;  %v1245_v45 = vadd.s32 4294967208, %v1064_v1 }
  0xde   : > { %v1186_v52 = vpop.eup %929  ;;  %949 = vrcp.f32 %v418_v41  ;;  %v274_v58 = vadd.f32 1.0, %v928_v48  ;;  %v805_v38 = vmul.f32 -1.442695, %v215_v24  ;;  %v664_v41 = vsub.s32 %v1222_v22, %v1181_v46 }
  0xdf   : > { %v1188_v55 = vpop.eup %931  ;;  %951 = vrcp.f32 %v273_v43  ;;  %v1242_v43 = vadd.s32 4294967216, %v1064_v1  ;;  %v1251_v48 = vadd.s32 4294967192, %v1064_v1  ;;  %v481_v3 = vmul.f32 %v1170_v23, %v1156_v54 }
  0xe0   : > { %v934_v57 = vpop.eup %933  ;;  %953 = vpow2.f32 %v819_v47  ;;  %v1248_v47 = vadd.s32 4294967200, %v1064_v1  ;;  %v520_v63 = vand.u32 2147483648, %v1219_v19 }
  0xe1   : > { %v936_v61 = vpop.eup %935  ;;  %v420_v2 = vadd.f32 1.0, %v934_v57  ;;  %955 = vpow2.f32 %v803_v51 }
  0xe2   : > { %v1197_v4 = vpop.eup %937  ;;  %957 = vrcp.f32 %v419_v53  ;;  %v1255_v53 = vadd.s32 4294967184, %v1064_v1  ;;  %v1259_v57 = vmul.f32 %v936_v61, %v1186_v52  ;;  %v485_v61 = vand.u32 2147483648, %v1156_v54 }
  0xe3   : > { %v940_v8 = vpop.eup %939  ;;  %959 = vrcp.f32 %v274_v58 }
  0xe4   : > { %v942_v13 = vpop.eup %941  ;;  %v275_v15 = vadd.f32 1.0, %v940_v8  ;;  %961 = vpow2.f32 %v820_v59 }
  0xe5   : > { %v944_v17 = vpop.eup %943  ;;  %963 = vrcp.f32 %v420_v2  ;;  %v421_v34 = vadd.f32 1.0, %v942_v13  ;;  %v476_v2 = vsel %vm475_vm2, %v1154_v50, %v474_v40  ;;  %v478_v13 = vand.u32 2147483648, %v1154_v50 }
  0xe6   : > { %v946_v25 = vpop.eup %945  ;;  %965 = vrcp.f32 %v275_v15  ;;  %v495_v50 = vmul.f32 %v1178_v42, %v1163_v10  ;;  %v502_v42 = vmul.f32 %v1188_v55, %v1166_v20  ;;  %vm512_vm2 = vcmp.eq.f32.partialorder %v1172_v27, 0.0 }
  0xe7   : > { %v948_v30 = vpop.eup %947  ;;  %967 = vpow2.f32 %v804_v12  ;;  %v1264_v8 = vmul.f32 %v946_v25, %v944_v17  ;;  %v492_v17 = vand.u32 2147483648, %v1159_v60 }
  0xe8   : > { %v950_v35 = vpop.eup %949  ;;  %v276_v37 = vadd.f32 1.0, %v948_v30  ;;  %969 = vpow2.f32 %v821_v16  ;;  %v1276_v16 = vsel %vm477_vm3, %v478_v13, %v476_v2  ;;  %v483_v30 = vsel %vm482_vm4, %v1156_v54, %v481_v3 }
  0xe9   : > { %v952_v39 = vpop.eup %951  ;;  %971 = vrsqrt.f32 %v1219_v19  ;;  %v497_v55 = vsel %vm496_vm9, %v1163_v10, %v495_v50  ;;  %vm645_vm3 = vcmask 458112   ;;  %vm517_vm4 = vcmp.eq.f32.partialorder %v1219_v19, inf }
  0xea   : > { %v954_v44 = vpop.eup %953  ;;  %973 = vrcp.f32 %v421_v34  ;;  %v1272_v15 = vmul.f32 %v952_v39, %v950_v35  ;;  %v488_v34 = vmul.f32 %v1175_v31, %v1159_v60  ;;  %v499_v31 = vand.u32 2147483648, %v1163_v10 }
  0xeb   : > { %v956_v21 = vpop.eup %955  ;;  %975 = vrcp.f32 %v276_v37  ;;  %v422_v51 = vadd.f32 1.0, %v954_v44  ;;  %vm533_vm9 = vcmp.eq.f32.partialorder %v1264_v8, 0.0 }
  0xec   : > { %v958_v56 = vpop.eup %957  ;;  %v277_v58 = vadd.f32 1.0, %v956_v21  ;;  %977 = vpow2.f32 %v805_v38  ;;  %v486_v21 = vsel %vm484_vm5, %v485_v61, %v483_v30  ;;  %vm519_vm5 = vcmp.eq.f32.partialorder %v1219_v19, 0.0 }
  0xed   : > { %v960_v59 = vpop.eup %959  ;;  %979 = vrcp.f32 %v422_v51 }
  0xee   : > { %v962_v12 = vpop.eup %961  ;;  %981 = vrcp.f32 %v277_v58  ;;  %v1284_v35 = vmul.f32 %v960_v59, %v958_v56  ;;  %v490_v56 = vsel %vm489_vm6, %v1159_v60, %v488_v34  ;;  %v509_v58 = vmul.f32 %v1197_v4, %v1172_v27 }
  0xef   : > { %v964_v52 = vpop.eup %963  ;;  %983 = vrsqrt.f32 %v1259_v57  ;;  %v423_v24 = vadd.f32 1.0, %v962_v12  ;;  %v506_v12 = vand.u32 2147483648, %v1166_v20  ;;  %v493_v61 = vsel %vm491_vm7, %v492_v17, %v490_v56 }
  0xf0   : > { %v966_v23 = vpop.eup %965  ;;  %985 = vrsqrt.f32 %v1264_v8  ;;  %v609_v60 = vrot.slane %v486_v21, %v608_v62  ;;  %v513_v17 = vand.u32 2147483648, %v1172_v27  ;;  %v616_v10 = vrot.slane %v493_v61, %v615_v18 }
  0xf1   : > { %v968_v25 = vpop.eup %967  ;;  %v1288_v38 = vmul.f32 %v966_v23, %v964_v52  ;;  %987 = vrcp.f32 %v423_v24  ;;  %v504_v23 = vsel %vm503_vm12, %v1166_v20, %v502_v42  ;;  %v500_v24 = vsel %vm498_vm10, %v499_v31, %v497_v55 }
  0xf2   : > { %v970_v37 = vpop.eup %969  ;;  %v278_v39 = vadd.f32 1.0, %v968_v25  ;;  %989 = vrsqrt.f32 %v1272_v15  ;;  %v511_v25 = vsel %vm510_vm1, %v1172_v27, %v509_v58  ;;  %v507_v50 = vsel %vm505_vm14, %v506_v12, %v504_v23 }
  0xf3   : > { %v972_v40 = vpop.eup %971  ;;  %v424_v54 = vadd.f32 1.0, %v970_v37  ;;  %v604_v27 = vrot.slane %v1276_v16, %v603_v0  ;;  %v623_v62 = vrot.slane %v500_v24, %v622_v26  ;;  %v671_v31 = vsub.s32 %v1242_v43, %v1181_v46 }
  0xf4   : > { %v974_v44 = vpop.eup %973  ;;  %991 = vrcp.f32 %v278_v39  ;;  %v516_v4 = vmul.f32 %v972_v40, %v1219_v19  ;;  %v514_v40 = vsel %vm512_vm2, %v513_v17, %v511_v25  ;;  %v630_v5 = vrot.slane %v507_v50, %v629_v28 }
  0xf5   : > { %v976_v51 = vpop.eup %975  ;;  %993 = vrsqrt.f32 %v1284_v35  ;;  %v611_v0 = vsel %vm610_vm8, %v609_v60, %v604_v27  ;;  %v685_v16 = vsub.s32 %v1248_v47, %v1181_v46  ;;  %v692_v56 = vsub.s32 %v1251_v48, %v1181_v46 }
  0xf6   : > { %v978_v59 = vpop.eup %977  ;;  %995 = vrsqrt.f32 %v1288_v38  ;;  %v1310_v2 = vmul.f32 %v976_v51, %v974_v44  ;;  %v518_v39 = vsel %vm517_vm4, %v1219_v19, %v516_v4  ;;  %v678_v44 = vsub.s32 %v1245_v45, %v1181_v46 }
  0xf7   : > { %v980_v3 = vpop.eup %979  ;;  %997 = vrcp.f32 %v424_v54  ;;  %v279_v13 = vadd.f32 1.0, %v978_v59  ;;  %v521_v26 = vsel %vm519_vm5, %v520_v63, %v518_v39  ;;  %v618_v42 = vsel %vm617_vm11, %v616_v10, %v611_v0 }
  0xf8   : > { %v982_v52 = vpop.eup %981  ;;  %999 = vrsqrt.f32 %v1310_v2  ;;  %v637_v51 = vrot.slane %v514_v40, %v636_v29  ;;  %v625_v6 = vsel %vm624_vm13, %v623_v62, %v618_v42  ;;  %vm524_vm6 = vcmp.eq.f32.partialorder %v1259_v57, inf }
  0xf9   : > { %v1324_v30 = vmul.f32 %v982_v52, %v980_v3  ;;  %1001 = vrcp.f32 %v279_v13  ;;  %v984_v34 = vpop.eup %983  ;;  %v699_v59 = vsub.s32 %v1255_v53, %v1181_v46  ;;  %v644_v7 = vrot.slane %v521_v26, %v643_v32 }
  0xfa   : > { %v986_v37 = vpop.eup %985  ;;  %v523_v20 = vmul.f32 %v984_v34, %v1259_v57  ;;  %v632_v4 = vsel %vm631_vm15, %v630_v5, %v625_v6  ;;  %vm526_vm7 = vcmp.eq.f32.partialorder %v1259_v57, 0.0  ;;  %v527_v13 = vand.u32 2147483648, %v1259_v57 }
  0xfb   : > { %1003 = vrsqrt.f32 %v1324_v30  ;;  %v988_v49 = vpop.eup %987  ;;  %v530_v28 = vmul.f32 %v986_v37, %v1264_v8  ;;  %v1382_v52 = vadd.s32 4294967176, %v1064_v1  ;;  %v639_v9 = vsel %vm638_vm0, %v637_v51, %v632_v4 }
  0xfc   : > { %v990_v18 = vpop.eup %989  ;;  %v525_v29 = vsel %vm524_vm6, %v1259_v57, %v523_v20  ;;  %vm531_vm8 = vcmp.eq.f32.partialorder %v1264_v8, inf  ;;  %vm538_vm10 = vcmp.eq.f32.partialorder %v1272_v15, inf  ;;  %vm652_vm11 = vcmask 523712  }
  0xfd   : > { %v537_v3 = vmul.f32 %v990_v18, %v1272_v15  ;;  %v528_v32 = vsel %vm526_vm7, %v527_v13, %v525_v29  ;;  %v532_v23 = vsel %vm531_vm8, %v1264_v8, %v530_v28  ;;  %v646_v1 = vsel %vm645_vm3, %v644_v7, %v639_v9 }
  0xfe   : > { %v992_v21 = vpop.eup %991  ;;  %vm659_vm12 = vcmask 589312   ;;  %v534_v34 = vand.u32 2147483648, %v1264_v8  ;;  %vm666_vm13 = vcmask 654912   ;;  %vm540_vm14 = vcmp.eq.f32.partialorder %v1272_v15, 0.0 }
  0xff   : > { %v994_v19 = vpop.eup %993  ;;  %v1365_v58 = vmul.f32 %v992_v21, %v988_v49  ;;  %v539_v60 = vsel %vm538_vm10, %v1272_v15, %v537_v3  ;;  %v541_v37 = vand.u32 2147483648, %v1272_v15  ;;  %v651_v50 = vrot.slane %v528_v32, %v650_v33 }
 0x100   : > { %v996_v54 = vpop.eup %995  ;;  %v544_v24 = vmul.f32 %v994_v19, %v1284_v35  ;;  %v535_v39 = vsel %vm533_vm9, %v534_v34, %v532_v23  ;;  %vm673_vm15 = vcmask 720512   ;;  %vm545_vm0 = vcmp.eq.f32.partialorder %v1284_v35, inf }
 0x101   : > { %v998_v55 = vpop.eup %997  ;;  %1005 = vrsqrt.f32 %v1365_v58  ;;  %v551_v17 = vmul.f32 %v996_v54, %v1288_v38  ;;  %v542_v27 = vsel %vm540_vm14, %v541_v37, %v539_v60  ;;  %vm547_vm1 = vcmp.eq.f32.partialorder %v1284_v35, 0.0 }
 0x102   : > { %v1000_v12 = vpop.eup %999  ;;  %v546_v62 = vsel %vm545_vm0, %v1284_v35, %v544_v24  ;;  %vm552_vm2 = vcmp.eq.f32.partialorder %v1288_v38, inf  ;;  %v548_v15 = vand.u32 2147483648, %v1284_v35  ;;  %vm554_vm3 = vcmp.eq.f32.partialorder %v1288_v38, 0.0 }
 0x103   : > { %v1002_v61 = vpop.eup %1001  ;;  %v558_v10 = vmul.f32 %v1000_v12, %v1310_v2  ;;  %v553_v11 = vsel %vm552_vm2, %v1288_v38, %v551_v17  ;;  %vm559_vm4 = vcmp.eq.f32.partialorder %v1310_v2, inf  ;;  %v658_v33 = vrot.slane %v535_v39, %v657_v36 }
 0x104   : > { %v1390_v25 = vmul.f32 %v1002_v61, %v998_v55  ;;  %v555_v8 = vand.u32 2147483648, %v1288_v38  ;;  %vm566_vm5 = vcmp.eq.f32.partialorder %v1324_v30, inf  ;;  %v665_v35 = vrot.slane %v542_v27, %v664_v41 }
 0x105   : > { %v1004_v57 = vpop.eup %1003  ;;  %v560_v40 = vsel %vm559_vm4, %v1310_v2, %v558_v10  ;;  %v549_v18 = vsel %vm547_vm1, %v548_v15, %v546_v62  ;;  %v562_v20 = vand.u32 2147483648, %v1310_v2  ;;  %vm561_vm6 = vcmp.eq.f32.partialorder %v1310_v2, 0.0 }
 0x106   : > { %1007 = vrsqrt.f32 %v1390_v25  ;;  %v565_v49 = vmul.f32 %v1004_v57, %v1324_v30  ;;  %v556_v0 = vsel %vm554_vm3, %v555_v8, %v553_v11  ;;  %v569_v14 = vand.u32 2147483648, %v1324_v30 }
 0x107   : > { %v563_v38 = vsel %vm561_vm6, %v562_v20, %v560_v40  ;;  %vm568_vm7 = vcmp.eq.f32.partialorder %v1324_v30, 0.0  ;;  %vm573_vm8 = vcmp.eq.f32.partialorder %v1365_v58, inf  ;;  %v576_v22 = vand.u32 2147483648, %v1365_v58 }
 0x108   : > { %v567_v21 = vsel %vm566_vm5, %v1324_v30, %v565_v49  ;;  %v672_v41 = vrot.slane %v549_v18, %v671_v31  ;;  %vm575_vm9 = vcmp.eq.f32.partialorder %v1365_v58, 0.0  ;;  %v653_v2 = vsel %vm652_vm11, %v651_v50, %v646_v1 }
 0x109   : > { %v570_v5 = vsel %vm568_vm7, %v569_v14, %v567_v21  ;;  %vm680_vm10 = vcmask 786112   ;;  %v679_v30 = vrot.slane %v556_v0, %v678_v44  ;;  %v660_v51 = vsel %vm659_vm12, %v658_v33, %v653_v2 }
 0x10a   : > { %vm687_vm14 = vcmask 851712   ;;  %v686_v43 = vrot.slane %v563_v38, %v685_v16  ;;  %vm694_vm0 = vcmask 917312   ;;  %v667_v31 = vsel %vm666_vm13, %v665_v35, %v660_v51 }
 0x10b   : > { %v1006_v63 = vpop.eup %1005  ;;  %v706_v45 = vsub.s32 %v1382_v52, %v1181_v46  ;;  %v674_v54 = vsel %vm673_vm15, %v672_v41, %v667_v31  ;;  %vm580_vm11 = vcmp.eq.f32.partialorder %v1390_v25, inf  ;;  %v583_v16 = vand.u32 2147483648, %v1390_v25 }
 0x10c   : > { %v572_v36 = vmul.f32 %v1006_v63, %v1365_v58  ;;  %v681_v6 = vsel %vm680_vm10, %v679_v30, %v674_v54  ;;  %vm701_vm12 = vcmask 982912   ;;  %vm582_vm13 = vcmp.eq.f32.partialorder %v1390_v25, 0.0 }
 0x10d   : > { %vm708_vm1 = vcmask 1048512  }
 0x10e   : > { %v574_v26 = vsel %vm573_vm8, %v1365_v58, %v572_v36  ;;  %v693_v58 = vrot.slane %v570_v5, %v692_v56  ;;  %v688_v56 = vsel %vm687_vm14, %v686_v43, %v681_v6 }
 0x10f   : > { %v577_v19 = vsel %vm575_vm9, %v576_v22, %v574_v26 }
 0x110   : > { %v1008_v42 = vpop.eup %1007  ;;  %v700_v47 = vrot.slane %v577_v19, %v699_v59  ;;  %v695_v55 = vsel %vm694_vm0, %v693_v58, %v688_v56 }
 0x111   : > { %v579_v44 = vmul.f32 %v1008_v42, %v1390_v25 }
 0x112   : > { %v702_v53 = vsel %vm701_vm12, %v700_v47, %v695_v55 }
 0x113   : > { %v581_v48 = vsel %vm580_vm11, %v1390_v25, %v579_v44 }
 0x114   : > { %v584_v28 = vsel %vm582_vm13, %v583_v16, %v581_v48 }
 0x115   : > { %v707_v46 = vrot.slane %v584_v28, %v706_v45 }
 0x117   : > { %v709_v59 = vsel %vm708_vm1, %v707_v46, %v702_v53 }
 0x118   : > { %711 = vst [vmem:[%s148_s16] sm:$0x1] %v709_v59 }
 0x119 PF: > { %s11_s8 = sadd.s32 1, %s1031_s8   ;;  %s1476_s6 = smov %s1027_s7 }
 0x11a   : > { %p8_p5 = scmp.ge.s32.totalorder %s11_s8, 4   ;;  %s1477_s7 = smov %s1479_s9 }
 0x11c   :  { %10 = sbr.rel (!%p8_p5) target bundleno = 2 (0x2), region = 54 }

</bundles_post_ra>
